<compile_context>
chip_gen: v5e
topology: v5e:2x2
jax: 0.10.0
libtpu: 0.0.40
codegen_flags: <defaults>
</compile_context>

<pallas_src>
import math

import jax
import jax.numpy as jnp
from jax.experimental import pallas as pl
from jax.experimental.pallas import tpu as pltpu

_EPS = 1e-7


def _atan(x):
    """Cephes-style single-precision arctangent (VPU + EUP reciprocal)."""
    sign = jnp.where(x < 0.0, jnp.float32(-1.0), jnp.float32(1.0))
    t = jnp.abs(x)
    big = t > jnp.float32(2.414213562373095)    # tan(3*pi/8)
    mid = t > jnp.float32(0.4142135623730951)   # tan(pi/8)
    y = jnp.where(big, jnp.float32(math.pi / 2.0),
                  jnp.where(mid, jnp.float32(math.pi / 4.0), jnp.float32(0.0)))
    safe_t = jnp.maximum(t, jnp.float32(1e-30))
    inv_t = pl.reciprocal(safe_t, approx=True)
    inv_tp1 = pl.reciprocal(t + 1.0, approx=True)
    xr = jnp.where(big, -inv_t, jnp.where(mid, (t - 1.0) * inv_tp1, t))
    z = xr * xr
    p = ((((jnp.float32(8.05374449538e-2) * z - jnp.float32(1.38776856032e-1)) * z
           + jnp.float32(1.99777106478e-1)) * z
          - jnp.float32(3.33329491539e-1)) * z * xr + xr)
    return sign * (y + p)


def _chunk_ciou_loss(pb, tb, w):
    """(1 - CIoU) * weight for one (8, 128) chunk of anchors.

    pb, tb: (4, 8, 128) [x1, y1, x2, y2];  w: (8, 128) masked weight.
    """
    eps = jnp.float32(_EPS)
    b1_x1, b1_y1, b1_x2, b1_y2 = pb[0], pb[1], pb[2], pb[3]
    b2_x1, b2_y1, b2_x2, b2_y2 = tb[0], tb[1], tb[2], tb[3]

    w1 = b1_x2 - b1_x1
    h1 = b1_y2 - b1_y1 + eps
    w2 = b2_x2 - b2_x1
    h2 = b2_y2 - b2_y1 + eps

    # Intersection / union / IoU.
    inter = (jnp.maximum(jnp.minimum(b1_x2, b2_x2) - jnp.maximum(b1_x1, b2_x1), 0.0) *
             jnp.maximum(jnp.minimum(b1_y2, b2_y2) - jnp.maximum(b1_y1, b2_y1), 0.0))
    union = w1 * h1 + w2 * h2 - inter + eps
    iou = inter * pl.reciprocal(union, approx=True)

    # CIoU terms.
    cw = jnp.maximum(b1_x2, b2_x2) - jnp.minimum(b1_x1, b2_x1)
    ch = jnp.maximum(b1_y2, b2_y2) - jnp.minimum(b1_y1, b2_y1)
    c2 = cw * cw + ch * ch + eps
    rho2 = ((b2_x1 + b2_x2 - b1_x1 - b1_x2) ** 2 +
            (b2_y1 + b2_y2 - b1_y1 - b1_y2) ** 2) * jnp.float32(0.25)

    r1 = w1 * pl.reciprocal(h1, approx=True)
    r2 = w2 * pl.reciprocal(h2, approx=True)
    # atan(r2) - atan(r1) == atan((r2 - r1) / (1 + r1*r2))  (valid: r1*r2 > -1,
    # which holds for non-degenerate boxes where widths are >= 0).
    # TODO(synk): guard/clamp if degenerate boxes (x2 < x1) are possible.
    dr = (r2 - r1) * pl.reciprocal(1.0 + r1 * r2, approx=True)
    d_atan = _atan(dr)
    v = jnp.float32(4.0 / (math.pi ** 2)) * d_atan * d_atan
    alpha = v * pl.reciprocal(v - iou + (1.0 + eps), approx=True)
    ciou = iou - (rho2 * pl.reciprocal(c2, approx=True) + v * alpha)

    return (1.0 - ciou) * w   # padded anchors have w == 0 -> contribute 0


def _bbox_loss_kernel(pb_ref, tb_ref, w_ref, out_ref):
    # pb_ref/tb_ref: (4, TR, 128);  w_ref: (TR, 128);  out_ref: (8, 128).
    tr = w_ref.shape[0]
    acc = jnp.zeros((8, 128), jnp.float32)
    for r in range(0, tr, 8):   # static unroll; each sub-chunk is 1 vreg wide
        acc = acc + _chunk_ciou_loss(pb_ref[:, r:r + 8, :],
                                     tb_ref[:, r:r + 8, :],
                                     w_ref[r:r + 8, :])
    out_ref[...] = acc


def _cdiv(a, b):
    return -(-a // b)


def _round_up(a, b):
    return _cdiv(a, b) * b


def bbox_loss(pred_dist, pred_bboxes, anchor_points, target_bboxes,
              target_scores, target_scores_sum, fg_mask,
              reg_max=16, use_dfl=False):
    """JAX/Pallas equivalent of BboxLoss.forward (use_dfl=False path)."""
    del pred_dist, anchor_points, reg_max  # only used by the DFL path
    assert not use_dfl, "DFL path not implemented (module default use_dfl=False)"

    B, N, _ = pred_bboxes.shape
    M = B * N

    # Anchor axis -> (Sp, 128) lane/sublane-dense layout, tiled over a 1-D grid.
    S = _cdiv(M, 128)                               # rows of 128 anchors
    n_tiles = _cdiv(S, 256)                         # <= 256 rows (32 vreg-rows) per tile
    TR = _round_up(_cdiv(S, n_tiles), 8)            # rows per tile (multiple of 8)
    Sp = n_tiles * TR
    Mp = Sp * 128

    def pad_rows(x):
        x = x.reshape(M, -1).astype(jnp.float32)
        if Mp != M:
            x = jnp.pad(x, ((0, Mp - M), (0, 0)))
        return x

    # Masked per-anchor weight computed in XLA (fuses with upstream producers);
    # the big (B, N, C) score tensor never enters the kernel.
    weight = target_scores.sum(-1) * fg_mask.astype(target_scores.dtype)   # (B, N)
    w = pad_rows(weight.reshape(B, N, 1)).reshape(Sp, 128)

    # Boxes -> coordinate-major (4, Sp, 128).  The transpose only touches the
    # small 4-coordinate tensors (~4*M floats), not the class scores.
    pb = pad_rows(pred_bboxes).T.reshape(4, Sp, 128)
    tb = pad_rows(target_bboxes).T.reshape(4, Sp, 128)

    out = pl.pallas_call(
        _bbox_loss_kernel,
        out_shape=jax.ShapeDtypeStruct((n_tiles, 8, 128), jnp.float32),
        grid=(n_tiles,),
        in_specs=[
            pl.BlockSpec((4, TR, 128), lambda i: (0, i, 0)),
            pl.BlockSpec((4, TR, 128), lambda i: (0, i, 0)),
            pl.BlockSpec((TR, 128), lambda i: (i, 0)),
        ],
        out_specs=pl.BlockSpec((None, 8, 128), lambda i: (i, 0, 0)),
        compiler_params=pltpu.CompilerParams(
            dimension_semantics=("parallel",),
            vmem_limit_bytes=32 * 1024 * 1024),
    )(pb, tb, w)

    loss_iou = jnp.sum(out) / jnp.asarray(target_scores_sum, jnp.float32)
    loss_dfl = jnp.float32(0.0)
    return loss_iou, loss_dfl


def _reference_loss_iou(pred_bboxes, target_bboxes, target_scores,
                        target_scores_sum, fg_mask):
    """Pure-JAX reference (uses jnp.arctan) for a sanity check."""
    eps = _EPS
    b1_x1, b1_y1, b1_x2, b1_y2 = jnp.split(pred_bboxes, 4, axis=-1)
    b2_x1, b2_y1, b2_x2, b2_y2 = jnp.split(target_bboxes, 4, axis=-1)
    w1, h1 = b1_x2 - b1_x1, b1_y2 - b1_y1 + eps
    w2, h2 = b2_x2 - b2_x1, b2_y2 - b2_y1 + eps
    inter = (jnp.maximum(jnp.minimum(b1_x2, b2_x2) - jnp.maximum(b1_x1, b2_x1), 0.0) *
             jnp.maximum(jnp.minimum(b1_y2, b2_y2) - jnp.maximum(b1_y1, b2_y1), 0.0))
    union = w1 * h1 + w2 * h2 - inter + eps
    iou = inter / union
    cw = jnp.maximum(b1_x2, b2_x2) - jnp.minimum(b1_x1, b2_x1)
    ch = jnp.maximum(b1_y2, b2_y2) - jnp.minimum(b1_y1, b2_y1)
    c2 = cw ** 2 + ch ** 2 + eps
    rho2 = ((b2_x1 + b2_x2 - b1_x1 - b1_x2) ** 2 +
            (b2_y1 + b2_y2 - b1_y1 - b1_y2) ** 2) / 4.0
    v = (4.0 / math.pi ** 2) * (jnp.arctan(w2 / h2) - jnp.arctan(w1 / h1)) ** 2
    alpha = v / (v - iou + (1.0 + eps))
    ciou = (iou - (rho2 / c2 + v * alpha))[..., 0]        # (B, N)
    weight = target_scores.sum(-1)                        # (B, N)
    loss = jnp.where(fg_mask, (1.0 - ciou) * weight, 0.0).sum() / target_scores_sum
    return loss


if __name__ == "__main__":
    key = jax.random.PRNGKey(0)
    B, N, C, reg_max = 2, 128, 8, 16
    k1, k2, k3, k4, k5, k6, k7 = jax.random.split(key, 7)

    xy1 = jax.random.uniform(k1, (B, N, 2), minval=0.0, maxval=10.0)
    wh_p = jax.random.uniform(k2, (B, N, 2), minval=0.5, maxval=5.0)
    pred_bboxes = jnp.concatenate([xy1, xy1 + wh_p], axis=-1)          # xyxy

    txy1 = xy1 + jax.random.uniform(k3, (B, N, 2), minval=-1.0, maxval=1.0)
    wh_t = jax.random.uniform(k4, (B, N, 2), minval=0.5, maxval=5.0)
    target_bboxes = jnp.concatenate([txy1, txy1 + wh_t], axis=-1)      # xyxy

    target_scores = jax.random.uniform(k5, (B, N, C))
    fg_mask = jax.random.bernoulli(k6, 0.5, (B, N))
    target_scores_sum = jnp.maximum(target_scores.sum(), 1.0)

    pred_dist = jax.random.normal(k7, (B, N, 4 * (reg_max + 1)))  # unused (use_dfl=False)
    anchor_points = jax.random.uniform(k7, (N, 2)) * 16.0         # unused (use_dfl=False)

    loss_iou, loss_dfl = bbox_loss(pred_dist, pred_bboxes, anchor_points,
                                   target_bboxes, target_scores,
                                   target_scores_sum, fg_mask)
    jax.block_until_ready((loss_iou, loss_dfl))

    ref = _reference_loss_iou(pred_bboxes, target_bboxes, target_scores,
                              target_scores_sum, fg_mask)
    assert abs(float(loss_iou) - float(ref)) <= 1e-3 * max(1.0, abs(float(ref))), \
        (float(loss_iou), float(ref))
    assert float(loss_dfl) == 0.0

    print("KERNEL_OK")
</pallas_src>

<mosaic_0001>
module attributes {stable_mosaic.version = 11 : i64} {
  func.func @_bbox_loss_kernel(%arg0: i32, %arg1: memref<4x8x128xf32, #tpu.memory_space<vmem>>, %arg2: memref<4x8x128xf32, #tpu.memory_space<vmem>>, %arg3: memref<8x128xf32, #tpu.memory_space<vmem>>, %arg4: memref<1x8x128xf32, #tpu.memory_space<vmem>>) attributes {dimension_semantics = [#tpu.dimension_semantics<parallel>], iteration_bounds = array<i64: 1>, scalar_prefetch = 0 : i64, scratch_operands = 0 : i64, tpu.core_type = #tpu.core_type<tc>, window_params = [{transform_indices = @transform_0, window_bounds = array<i64: 4, 8, 128>}, {transform_indices = @transform_1, window_bounds = array<i64: 4, 8, 128>}, {transform_indices = @transform_2, window_bounds = array<i64: 8, 128>}, {transform_indices = @transform_3, window_bounds = array<i64: 1, 8, 128>}]} {
    %cst = arith.constant 0.000000e+00 : f32
    %0 = vector.broadcast %cst : f32 to vector<8x128xf32>
    %c0 = arith.constant 0 : index
    %c0_0 = arith.constant 0 : index
    %c0_1 = arith.constant 0 : index
    %1 = vector.load %arg1[%c0, %c0_0, %c0_1] : memref<4x8x128xf32, #tpu.memory_space<vmem>>, vector<4x8x128xf32>
    %c0_2 = arith.constant 0 : index
    %c0_3 = arith.constant 0 : index
    %c0_4 = arith.constant 0 : index
    %2 = vector.load %arg2[%c0_2, %c0_3, %c0_4] : memref<4x8x128xf32, #tpu.memory_space<vmem>>, vector<4x8x128xf32>
    %c0_5 = arith.constant 0 : index
    %c0_6 = arith.constant 0 : index
    %3 = vector.load %arg3[%c0_5, %c0_6] : memref<8x128xf32, #tpu.memory_space<vmem>>, vector<8x128xf32>
    %4 = vector.extract_strided_slice %1 {offsets = [0, 0, 0], sizes = [1, 8, 128], strides = [1, 1, 1]} : vector<4x8x128xf32> to vector<1x8x128xf32>
    %5 = vector.shape_cast %4 : vector<1x8x128xf32> to vector<8x128xf32>
    %6 = vector.extract_strided_slice %1 {offsets = [1, 0, 0], sizes = [1, 8, 128], strides = [1, 1, 1]} : vector<4x8x128xf32> to vector<1x8x128xf32>
    %7 = vector.shape_cast %6 : vector<1x8x128xf32> to vector<8x128xf32>
    %8 = vector.extract_strided_slice %1 {offsets = [2, 0, 0], sizes = [1, 8, 128], strides = [1, 1, 1]} : vector<4x8x128xf32> to vector<1x8x128xf32>
    %9 = vector.shape_cast %8 : vector<1x8x128xf32> to vector<8x128xf32>
    %10 = vector.extract_strided_slice %1 {offsets = [3, 0, 0], sizes = [1, 8, 128], strides = [1, 1, 1]} : vector<4x8x128xf32> to vector<1x8x128xf32>
    %11 = vector.shape_cast %10 : vector<1x8x128xf32> to vector<8x128xf32>
    %12 = vector.extract_strided_slice %2 {offsets = [0, 0, 0], sizes = [1, 8, 128], strides = [1, 1, 1]} : vector<4x8x128xf32> to vector<1x8x128xf32>
    %13 = vector.shape_cast %12 : vector<1x8x128xf32> to vector<8x128xf32>
    %14 = vector.extract_strided_slice %2 {offsets = [1, 0, 0], sizes = [1, 8, 128], strides = [1, 1, 1]} : vector<4x8x128xf32> to vector<1x8x128xf32>
    %15 = vector.shape_cast %14 : vector<1x8x128xf32> to vector<8x128xf32>
    %16 = vector.extract_strided_slice %2 {offsets = [2, 0, 0], sizes = [1, 8, 128], strides = [1, 1, 1]} : vector<4x8x128xf32> to vector<1x8x128xf32>
    %17 = vector.shape_cast %16 : vector<1x8x128xf32> to vector<8x128xf32>
    %18 = vector.extract_strided_slice %2 {offsets = [3, 0, 0], sizes = [1, 8, 128], strides = [1, 1, 1]} : vector<4x8x128xf32> to vector<1x8x128xf32>
    %19 = vector.shape_cast %18 : vector<1x8x128xf32> to vector<8x128xf32>
    %20 = arith.subf %9, %5 : vector<8x128xf32>
    %21 = arith.subf %11, %7 : vector<8x128xf32>
    %cst_7 = arith.constant 1.000000e-07 : f32
    %22 = vector.broadcast %cst_7 : f32 to vector<8x128xf32>
    %23 = arith.addf %21, %22 : vector<8x128xf32>
    %24 = arith.subf %17, %13 : vector<8x128xf32>
    %25 = arith.subf %19, %15 : vector<8x128xf32>
    %cst_8 = arith.constant 1.000000e-07 : f32
    %26 = vector.broadcast %cst_8 : f32 to vector<8x128xf32>
    %27 = arith.addf %25, %26 : vector<8x128xf32>
    %28 = arith.minimumf %9, %17 : vector<8x128xf32>
    %29 = arith.maximumf %5, %13 : vector<8x128xf32>
    %30 = arith.subf %28, %29 : vector<8x128xf32>
    %cst_9 = arith.constant 0.000000e+00 : f32
    %31 = vector.broadcast %cst_9 : f32 to vector<8x128xf32>
    %32 = arith.maximumf %30, %31 : vector<8x128xf32>
    %33 = arith.minimumf %11, %19 : vector<8x128xf32>
    %34 = arith.maximumf %7, %15 : vector<8x128xf32>
    %35 = arith.subf %33, %34 : vector<8x128xf32>
    %cst_10 = arith.constant 0.000000e+00 : f32
    %36 = vector.broadcast %cst_10 : f32 to vector<8x128xf32>
    %37 = arith.maximumf %35, %36 : vector<8x128xf32>
    %38 = arith.mulf %32, %37 : vector<8x128xf32>
    %39 = arith.mulf %20, %23 : vector<8x128xf32>
    %40 = arith.mulf %24, %27 : vector<8x128xf32>
    %41 = arith.addf %39, %40 : vector<8x128xf32>
    %42 = arith.subf %41, %38 : vector<8x128xf32>
    %cst_11 = arith.constant 1.000000e-07 : f32
    %43 = vector.broadcast %cst_11 : f32 to vector<8x128xf32>
    %44 = arith.addf %42, %43 : vector<8x128xf32>
    %45 = tpu.reciprocal %44 {approx = true} : vector<8x128xf32> -> vector<8x128xf32>
    %46 = arith.mulf %38, %45 : vector<8x128xf32>
    %47 = arith.maximumf %9, %17 : vector<8x128xf32>
    %48 = arith.minimumf %5, %13 : vector<8x128xf32>
    %49 = arith.subf %47, %48 : vector<8x128xf32>
    %50 = arith.maximumf %11, %19 : vector<8x128xf32>
    %51 = arith.minimumf %7, %15 : vector<8x128xf32>
    %52 = arith.subf %50, %51 : vector<8x128xf32>
    %53 = arith.mulf %49, %49 : vector<8x128xf32>
    %54 = arith.mulf %52, %52 : vector<8x128xf32>
    %55 = arith.addf %53, %54 : vector<8x128xf32>
    %cst_12 = arith.constant 1.000000e-07 : f32
    %56 = vector.broadcast %cst_12 : f32 to vector<8x128xf32>
    %57 = arith.addf %55, %56 : vector<8x128xf32>
    %58 = arith.addf %13, %17 : vector<8x128xf32>
    %59 = arith.subf %58, %5 : vector<8x128xf32>
    %60 = arith.subf %59, %9 : vector<8x128xf32>
    %61 = arith.mulf %60, %60 : vector<8x128xf32>
    %62 = arith.addf %15, %19 : vector<8x128xf32>
    %63 = arith.subf %62, %7 : vector<8x128xf32>
    %64 = arith.subf %63, %11 : vector<8x128xf32>
    %65 = arith.mulf %64, %64 : vector<8x128xf32>
    %66 = arith.addf %61, %65 : vector<8x128xf32>
    %cst_13 = arith.constant 2.500000e-01 : f32
    %67 = vector.broadcast %cst_13 : f32 to vector<8x128xf32>
    %68 = arith.mulf %66, %67 : vector<8x128xf32>
    %69 = tpu.reciprocal %23 {approx = true} : vector<8x128xf32> -> vector<8x128xf32>
    %70 = arith.mulf %20, %69 : vector<8x128xf32>
    %71 = tpu.reciprocal %27 {approx = true} : vector<8x128xf32> -> vector<8x128xf32>
    %72 = arith.mulf %24, %71 : vector<8x128xf32>
    %73 = arith.subf %72, %70 : vector<8x128xf32>
    %74 = arith.mulf %70, %72 : vector<8x128xf32>
    %cst_14 = arith.constant 1.000000e+00 : f32
    %75 = vector.broadcast %cst_14 : f32 to vector<8x128xf32>
    %76 = arith.addf %75, %74 : vector<8x128xf32>
    %77 = tpu.reciprocal %76 {approx = true} : vector<8x128xf32> -> vector<8x128xf32>
    %78 = arith.mulf %73, %77 : vector<8x128xf32>
    %cst_15 = arith.constant 0.000000e+00 : f32
    %79 = vector.broadcast %cst_15 : f32 to vector<8x128xf32>
    %80 = arith.cmpf olt, %78, %79 : vector<8x128xf32>
    %cst_16 = arith.constant -1.000000e+00 : f32
    %cst_17 = arith.constant 1.000000e+00 : f32
    %81 = vector.broadcast %cst_16 : f32 to vector<8x128xf32>
    %82 = vector.broadcast %cst_17 : f32 to vector<8x128xf32>
    %83 = arith.select %80, %81, %82 : vector<8x128xi1>, vector<8x128xf32>
    %84 = math.absf %78 : vector<8x128xf32>
    %cst_18 = arith.constant 2.41421366 : f32
    %85 = vector.broadcast %cst_18 : f32 to vector<8x128xf32>
    %86 = arith.cmpf ogt, %84, %85 : vector<8x128xf32>
    %cst_19 = arith.constant 0.414213568 : f32
    %87 = vector.broadcast %cst_19 : f32 to vector<8x128xf32>
    %88 = arith.cmpf ogt, %84, %87 : vector<8x128xf32>
    %cst_20 = arith.constant 0.785398185 : f32
    %cst_21 = arith.constant 0.000000e+00 : f32
    %89 = vector.broadcast %cst_20 : f32 to vector<8x128xf32>
    %90 = vector.broadcast %cst_21 : f32 to vector<8x128xf32>
    %91 = arith.select %88, %89, %90 : vector<8x128xi1>, vector<8x128xf32>
    %cst_22 = arith.constant 1.57079637 : f32
    %92 = vector.broadcast %cst_22 : f32 to vector<8x128xf32>
    %93 = arith.select %86, %92, %91 : vector<8x128xi1>, vector<8x128xf32>
    %cst_23 = arith.constant 1.000000e-30 : f32
    %94 = vector.broadcast %cst_23 : f32 to vector<8x128xf32>
    %95 = arith.maximumf %84, %94 : vector<8x128xf32>
    %96 = tpu.reciprocal %95 {approx = true} : vector<8x128xf32> -> vector<8x128xf32>
    %cst_24 = arith.constant 1.000000e+00 : f32
    %97 = vector.broadcast %cst_24 : f32 to vector<8x128xf32>
    %98 = arith.addf %84, %97 : vector<8x128xf32>
    %99 = tpu.reciprocal %98 {approx = true} : vector<8x128xf32> -> vector<8x128xf32>
    %cst_25 = arith.constant 0.000000e+00 : f32
    %100 = vector.broadcast %cst_25 : f32 to vector<8x128xf32>
    %101 = arith.subf %100, %96 : vector<8x128xf32>
    %cst_26 = arith.constant 1.000000e+00 : f32
    %102 = vector.broadcast %cst_26 : f32 to vector<8x128xf32>
    %103 = arith.subf %84, %102 : vector<8x128xf32>
    %104 = arith.mulf %103, %99 : vector<8x128xf32>
    %105 = arith.select %88, %104, %84 : vector<8x128xi1>, vector<8x128xf32>
    %106 = arith.select %86, %101, %105 : vector<8x128xi1>, vector<8x128xf32>
    %107 = arith.mulf %106, %106 : vector<8x128xf32>
    %cst_27 = arith.constant 0.0805374458 : f32
    %108 = vector.broadcast %cst_27 : f32 to vector<8x128xf32>
    %109 = arith.mulf %108, %107 : vector<8x128xf32>
    %cst_28 = arith.constant 0.138776854 : f32
    %110 = vector.broadcast %cst_28 : f32 to vector<8x128xf32>
    %111 = arith.subf %109, %110 : vector<8x128xf32>
    %112 = arith.mulf %111, %107 : vector<8x128xf32>
    %cst_29 = arith.constant 0.199777111 : f32
    %113 = vector.broadcast %cst_29 : f32 to vector<8x128xf32>
    %114 = arith.addf %112, %113 : vector<8x128xf32>
    %115 = arith.mulf %114, %107 : vector<8x128xf32>
    %cst_30 = arith.constant 0.333329499 : f32
    %116 = vector.broadcast %cst_30 : f32 to vector<8x128xf32>
    %117 = arith.subf %115, %116 : vector<8x128xf32>
    %118 = arith.mulf %117, %107 : vector<8x128xf32>
    %119 = arith.mulf %118, %106 : vector<8x128xf32>
    %120 = arith.addf %119, %106 : vector<8x128xf32>
    %121 = arith.addf %93, %120 : vector<8x128xf32>
    %122 = arith.mulf %83, %121 : vector<8x128xf32>
    %cst_31 = arith.constant 0.405284733 : f32
    %123 = vector.broadcast %cst_31 : f32 to vector<8x128xf32>
    %124 = arith.mulf %123, %122 : vector<8x128xf32>
    %125 = arith.mulf %124, %122 : vector<8x128xf32>
    %126 = arith.subf %125, %46 : vector<8x128xf32>
    %cst_32 = arith.constant 1.000000e+00 : f32
    %cst_33 = arith.constant 1.000000e-07 : f32
    %127 = arith.addf %cst_32, %cst_33 : f32
    %128 = vector.broadcast %127 : f32 to vector<8x128xf32>
    %129 = arith.addf %126, %128 : vector<8x128xf32>
    %130 = tpu.reciprocal %129 {approx = true} : vector<8x128xf32> -> vector<8x128xf32>
    %131 = arith.mulf %125, %130 : vector<8x128xf32>
    %132 = tpu.reciprocal %57 {approx = true} : vector<8x128xf32> -> vector<8x128xf32>
    %133 = arith.mulf %68, %132 : vector<8x128xf32>
    %134 = arith.mulf %125, %131 : vector<8x128xf32>
    %135 = arith.addf %133, %134 : vector<8x128xf32>
    %136 = arith.subf %46, %135 : vector<8x128xf32>
    %cst_34 = arith.constant 1.000000e+00 : f32
    %137 = vector.broadcast %cst_34 : f32 to vector<8x128xf32>
    %138 = arith.subf %137, %136 : vector<8x128xf32>
    %139 = arith.mulf %138, %3 : vector<8x128xf32>
    %140 = arith.addf %0, %139 : vector<8x128xf32>
    %c0_35 = arith.constant 0 : index
    %c0_36 = arith.constant 0 : index
    %c0_37 = arith.constant 0 : index
    %141 = vector.load %arg4[%c0_35, %c0_36, %c0_37] : memref<1x8x128xf32, #tpu.memory_space<vmem>>, vector<1x8x128xf32>
    %142 = vector.shape_cast %141 : vector<1x8x128xf32> to vector<8x128xf32>
    %143 = vector.shape_cast %140 : vector<8x128xf32> to vector<1x8x128xf32>
    tpu.vector_store %arg4[%c0_35, %c0_36, %c0_37], %143 {strides = array<i32>} : memref<1x8x128xf32, #tpu.memory_space<vmem>>, vector<1x8x128xf32>,
    return
  }
  func.func @transform_0(%arg0: i32) -> (i32, i32, i32) {
    %c0_i32 = arith.constant 0 : i32
    %c0_i32_0 = arith.constant 0 : i32
    %c0_i32_1 = arith.constant 0 : i32
    return %c0_i32, %arg0, %c0_i32_0 : i32, i32, i32
  }
  func.func @transform_1(%arg0: i32) -> (i32, i32, i32) {
    %c0_i32 = arith.constant 0 : i32
    %c0_i32_0 = arith.constant 0 : i32
    %c0_i32_1 = arith.constant 0 : i32
    return %c0_i32, %arg0, %c0_i32_0 : i32, i32, i32
  }
  func.func @transform_2(%arg0: i32) -> (i32, i32) {
    %c0_i32 = arith.constant 0 : i32
    %c0_i32_0 = arith.constant 0 : i32
    return %arg0, %c0_i32 : i32, i32
  }
  func.func @transform_3(%arg0: i32) -> (i32, i32, i32) {
    %c0_i32 = arith.constant 0 : i32
    %c0_i32_0 = arith.constant 0 : i32
    %c0_i32_1 = arith.constant 0 : i32
    return %arg0, %c0_i32, %c0_i32_0 : i32, i32, i32
  }
}

</mosaic_0001>

<bundles_post_ra>
// kernel: tpu_custom_call.1
= control target key start
LH: loop header
LB: loop body
LE: loop exit
PB: predicated region body
PF: predicated region fallthrough
CT: control target
= control target key end

     0   :  { %8 = vsyncpa [#allocation3], 0  ;;  %s354_s0 = inlined_call_operand.hbm [shape: f32[4,8,128], index: 0, kind: input, shape index: {}]   ;;  %s355_s1 = inlined_call_operand.hbm [shape: f32[4,8,128], index: 1, kind: input, shape index: {}]   ;;  %s356_s2 = inlined_call_operand.hbm [shape: f32[8,128], index: 2, kind: input, shape index: {}]   ;;  %s357_s3 = inlined_call_operand.hbm [shape: f32[1,8,128], index: 3, kind: output, shape index: {}]  }
   0x1   :  { %9 = vsyncpa [#allocation6], 0 }
   0x2   :  { %10 = vsyncpa [#allocation4], 0  ;;  %s28_s14 = sshll.u32 %s355_s1, 4  ;;  %s310_s15 = smov [#allocation5]   ;;  %s29_s14 = int_to_ptr.hbm [resolvable:$true] %s28_s14 }
   0x3   :  { %s30_s16 = sshll.u32 %s310_s15, 4  ;;  %s15_s19 = sshll.u32 %s354_s0, 4  ;;  %s31_s16 = int_to_ptr.vmem [resolvable:$true] %s30_s16  ;;  %s16_s19 = int_to_ptr.hbm [resolvable:$true] %s15_s19 }
   0x4   :  { %s311_s20 = smov 128   ;;  %s312_s21 = smov 8  }
   0x5   :  { %36 = dma.hbm_to_vmem [thread:$0]  %s29_s14, 512, %s31_s16, [#allocation6], %s311_s20, %s311_s20, %s312_s21  }
   0x6   :  { %s313_s22 = smov [#allocation2]   ;;  %s42_s26 = sshll.u32 %s356_s2, 4  ;;  %s43_s26 = int_to_ptr.hbm [resolvable:$true] %s42_s26 }
   0x7   :  { %s17_s23 = sshll.u32 %s313_s22, 4  ;;  %s314_s1 = smov [#allocation7]   ;;  %s18_s23 = int_to_ptr.vmem [resolvable:$true] %s17_s23 }
   0x8   :  { %23 = dma.hbm_to_vmem [thread:$0]  %s16_s19, 512, %s18_s23, [#allocation3], %s311_s20, %s311_s20, %s312_s21  }
   0x9   :  { %s44_s27 = sshll.u32 %s314_s1, 4  ;;  %s45_s27 = int_to_ptr.vmem [resolvable:$true] %s44_s27 }
   0xa   :  { %47 = dma.hbm_to_vmem [thread:$0]  %s43_s26, 128, %s45_s27, [#allocation6]  }
   0xb   :  { %304 = dma.done.wait [#allocation3], 512  }
   0xc   :  { %305 = vsyncadd [#allocation3], 4294966784 }
   0xd   :  { %306 = dma.done.wait [#allocation6], 640  }
   0xe   :  { %307 = vsyncadd [#allocation6], 4294966656  ;;  %v61_v0 = vld [vmem:[#allocation2 + $0x8] sm:$0xff]  ;;  %v63_v1 = vld [vmem:[#allocation2 + $0x18] sm:$0xff]  ;;  %s317_s0 = smov [#allocation8]   ;;  %s170_s30 = sshll.u32 %s357_s3, 4  ;;  %s171_s30 = int_to_ptr.hbm [resolvable:$true] %s170_s30 }
   0xf   :  { %v65_v2 = vld [vmem:[#allocation5 + $0x8] sm:$0xff]  ;;  %v67_v3 = vld [vmem:[#allocation5 + $0x18] sm:$0xff]  ;;  %v70_v4 = vsub.f32 %v63_v1, %v61_v0  ;;  %v64_v6 = vld [vmem:[#allocation5] sm:$0xff]  ;;  %s168_s2 = sshll.u32 %s317_s0, 4  ;;  %s169_s2 = int_to_ptr.vmem [resolvable:$true] %s168_s2 }
  0x10   :  { %v73_v5 = vsub.f32 %v67_v3, %v65_v2  ;;  %v66_v7 = vld [vmem:[#allocation5 + $0x10] sm:$0xff]  ;;  %v94_v9 = vmax.f32 %v63_v1, %v67_v3  ;;  %v95_v10 = vmin.f32 %v61_v0, %v65_v2  ;;  %v60_v13 = vld [vmem:[#allocation2] sm:$0xff]  ;;  %v105_v15 = vadd.f32 %v67_v3, %v65_v2 }
  0x11   :  { %v71_v8 = vadd.f32 1e-07, %v70_v4  ;;  %v101_v12 = vadd.f32 %v66_v7, %v64_v6  ;;  %v62_v17 = vld [vmem:[#allocation2 + $0x10] sm:$0xff]  ;;  %v72_v23 = vsub.f32 %v66_v7, %v64_v6  ;;  %v92_v35 = vmin.f32 %v60_v13, %v64_v6 }
  0x12   :  { %v74_v11 = vadd.f32 1e-07, %v73_v5  ;;  %v96_v14 = vsub.f32 %v94_v9, %v95_v10  ;;  %v106_v18 = vsub.f32 %v105_v15, %v61_v0  ;;  %v69_v21 = vsub.f32 %v62_v17, %v60_v13 }
  0x13   :  { %v102_v16 = vsub.f32 %v101_v12, %v60_v13  ;;  %192 = vrcp.f32 %v71_v8  ;;  %v91_v34 = vmax.f32 %v62_v17, %v66_v7  ;;  %v75_v43 = vmin.f32 %v62_v17, %v66_v7 }
  0x14   :  { %194 = vrcp.f32 %v74_v11  ;;  %v107_v20 = vsub.f32 %v106_v18, %v63_v1  ;;  %v98_v42 = vmul.f32 %v96_v14, %v96_v14  ;;  %v76_v44 = vmax.f32 %v60_v13, %v64_v6 }
  0x15   :  { %v103_v19 = vsub.f32 %v102_v16, %v62_v17  ;;  %v93_v38 = vsub.f32 %v91_v34, %v92_v35  ;;  %v79_v45 = vmin.f32 %v63_v1, %v67_v3  ;;  %v80_v46 = vmax.f32 %v61_v0, %v65_v2 }
  0x16   :  { %v108_v24 = vmul.f32 %v107_v20, %v107_v20  ;;  %v77_v51 = vsub.f32 %v75_v43, %v76_v44  ;;  %v84_v55 = vmul.f32 %v71_v8, %v69_v21  ;;  %v85_v60 = vmul.f32 %v74_v11, %v72_v23 }
  0x17   :  { %v104_v22 = vmul.f32 %v103_v19, %v103_v19  ;;  %v97_v41 = vmul.f32 %v93_v38, %v93_v38  ;;  %v81_v52 = vsub.f32 %v79_v45, %v80_v46  ;;  %v315_v13 = vmov 0.0  }
  0x18   :  { %v78_v58 = vmax.f32 %v77_v51, 0.0  ;;  %v86_v1 = vadd.f32 %v85_v60, %v84_v55  ;;  %v316_v18 = vmov 1.0  }
  0x19   :  { %v193_v25 = vpop.eup %192  ;;  %v109_v26 = vadd.f32 %v108_v24, %v104_v22  ;;  %v99_v49 = vadd.f32 %v98_v42, %v97_v41  ;;  %v82_v59 = vmax.f32 %v81_v52, 0.0 }
  0x1a   :  { %v195_v27 = vpop.eup %194  ;;  %v112_v28 = vmul.f32 %v193_v25, %v69_v21 }
  0x1b   :  { %v114_v29 = vmul.f32 %v195_v27, %v72_v23  ;;  %v100_v56 = vadd.f32 1e-07, %v99_v49  ;;  %v83_v0 = vmul.f32 %v82_v59, %v78_v58  ;;  %v110_v3 = vmul.f32 0.25, %v109_v26 }
  0x1d   :  { %v116_v30 = vmul.f32 %v114_v29, %v112_v28  ;;  %v115_v32 = vsub.f32 %v114_v29, %v112_v28  ;;  %v87_v5 = vsub.f32 %v86_v1, %v83_v0 }
  0x1f   :  { %v117_v31 = vadd.f32 1.0, %v116_v30  ;;  %v88_v10 = vadd.f32 1e-07, %v87_v5 }
  0x21   :  { %196 = vrcp.f32 %v117_v31 }
  0x27   :  { %v197_v33 = vpop.eup %196 }
  0x28   :  { %v119_v36 = vmul.f32 %v197_v33, %v115_v32  ;;  %v68_v33 = vld [vmem:[#allocation7] sm:$0xff] }
  0x2a   :  { %v122_v37 = vand.u32 2147483647, %v119_v36  ;;  %vm120_vm2 = vcmp.lt.f32.partialorder %v119_v36, 0.0 }
  0x2b   :  { %v121_v19 = vsel %vm120_vm2, -1.0, %v316_v18 }
  0x2c   :  { %v127_v39 = vmax.f32 %v122_v37, 1e-30  ;;  %v129_v40 = vadd.f32 1.0, %v122_v37  ;;  %v181_v47 = vadd.f32 -1.0, %v122_v37  ;;  %vm124_vm0 = vcmp.gt.f32.partialorder %v122_v37, 0.41421357 }
  0x2d   :  { %vm123_vm1 = vcmp.gt.f32.partialorder %v122_v37, 2.4142137  ;;  %v125_v11 = vsel %vm124_vm0, 0.7853982, %v315_v13 }
  0x2e   :  { %198 = vrcp.f32 %v127_v39  ;;  %v126_v16 = vsel %vm123_vm1, 1.5707964, %v125_v11 }
  0x2f   :  { %200 = vrcp.f32 %v129_v40 }
  0x30   :  { %202 = vrcp.f32 %v100_v56 }
  0x31   :  { %204 = vrcp.f32 %v88_v10 }
  0x34   :  { %v199_v48 = vpop.eup %198 }
  0x35   :  { %v201_v50 = vpop.eup %200  ;;  %v131_v53 = vsub.f32 0.0, %v199_v48 }
  0x36   :  { %v133_v54 = vmul.f32 %v201_v50, %v181_v47  ;;  %v203_v6 = vpop.eup %202 }
  0x37   :  { %v155_v8 = vmul.f32 %v203_v6, %v110_v3  ;;  %v205_v21 = vpop.eup %204 }
  0x38   :  { %v134_v57 = vsel %vm124_vm0, %v133_v54, %v122_v37  ;;  %v90_v23 = vmul.f32 %v205_v21, %v83_v0 }
  0x39   :  { %v135_v61 = vsel %vm123_vm1, %v131_v53, %v134_v57 }
  0x3a   :  { %v136_v62 = vmul.f32 %v135_v61, %v135_v61 }
  0x3c   :  { %v137_v63 = vmul.f32 0.080537446, %v136_v62 }
  0x3e   :  { %v182_v2 = vadd.f32 -0.13877685, %v137_v63 }
  0x40   :  { %v139_v4 = vmul.f32 %v182_v2, %v136_v62 }
  0x42   :  { %v140_v7 = vadd.f32 0.19977711, %v139_v4 }
  0x44   :  { %v141_v9 = vmul.f32 %v140_v7, %v136_v62 }
  0x46   :  { %v183_v12 = vadd.f32 -0.3333295, %v141_v9 }
  0x48   :  { %v143_v14 = vmul.f32 %v183_v12, %v136_v62 }
  0x4a   :  { %v144_v15 = vmul.f32 %v143_v14, %v135_v61 }
  0x4c   :  { %v145_v17 = vadd.f32 %v144_v15, %v135_v61 }
  0x4e   :  { %v146_v20 = vadd.f32 %v145_v17, %v126_v16 }
  0x50   :  { %v147_v22 = vmul.f32 %v146_v20, %v121_v19 }
  0x52   :  { %v148_v24 = vmul.f32 0.40528473, %v147_v22 }
  0x54   :  { %v149_v25 = vmul.f32 %v148_v24, %v147_v22 }
  0x56   :  { %v150_v26 = vsub.f32 %v149_v25, %v90_v23 }
  0x58   :  { %v151_v27 = vadd.f32 1.0000001, %v150_v26 }
  0x5a   :  { %206 = vrcp.f32 %v151_v27 }
  0x60   :  { %v207_v28 = vpop.eup %206 }
  0x61   :  { %v153_v29 = vmul.f32 %v207_v28, %v149_v25 }
  0x63   :  { %v156_v30 = vmul.f32 %v153_v29, %v149_v25 }
  0x65   :  { %v157_v31 = vadd.f32 %v156_v30, %v155_v8 }
  0x67   :  { %v158_v32 = vsub.f32 %v90_v23, %v157_v31 }
  0x69   :  { %v159_v34 = vsub.f32 1.0, %v158_v32 }
  0x6b   :  { %v160_v35 = vmul.f32 %v159_v34, %v68_v33 }
  0x6d   :  { %162 = vst [vmem:[#allocation8] sm:$0xff] %v160_v35 }
  0x6e   :  { %173 = dma.vmem_to_hbm [thread:$0]  %s169_s2, 128, %s171_s30, [#allocation4]  }
  0x6f   :  { %308 = dma.done.wait [#allocation4], 128  }
  0x70   :  { %309 = vsyncadd [#allocation4], 4294967168 }
  0x71   :  { %178 = vsyncpa [#allocation3], 1 }
  0x72   :  { %179 = vsyncpa [#allocation6], 1 }
  0x73   :  { %180 = vsyncpa [#allocation4], 1 }

</bundles_post_ra>
